<compile_context>
chip_gen: v6e
topology: v6e:2x2x1
jax: 0.10.0
libtpu: 0.0.40
codegen_flags: <defaults>
</compile_context>

<pallas_src>
import functools

import jax
import jax.numpy as jnp
from jax.experimental import pallas as pl
from jax.experimental.pallas import tpu as pltpu

_LANE = 128


# --------------------------------------------------------------------------
# Kernel
# --------------------------------------------------------------------------
def _fused_mlp_kernel(x1_ref, x2_ref, wa_ref, wb_ref, b_ref, out_ref):
    """out = x1 @ Wa + x2 @ Wb + b   (single collapsed affine layer)."""
    acc = jnp.dot(x1_ref[...], wa_ref[...], preferred_element_type=jnp.float32)
    acc = acc + jnp.dot(x2_ref[...], wb_ref[...],
                        preferred_element_type=jnp.float32)
    acc = acc + b_ref[...]
    out_ref[...] = acc.astype(out_ref.dtype)
    # TODO(synk): if feature dims ever grow enough that the MXU/vst slots (not
    # DMA) bind, fold Wa/Wb into one (f1+f2, n) weight and do a single dot.


# --------------------------------------------------------------------------
# Helpers
# --------------------------------------------------------------------------
def _round_up(x, m):
    return ((x + m - 1) // m) * m


def _vmem_block_bytes(rows, cols, dtype):
    """Footprint of a (rows, cols) block in VMEM, honoring (8,128) tiling."""
    itemsize = jnp.dtype(dtype).itemsize
    sub = 8 * (4 // itemsize) if itemsize < 4 else 8  # f32:8  bf16:16  i8:32
    r = _round_up(max(int(rows), 1), sub)
    c = _round_up(max(int(cols), 1), _LANE)
    return r * c * itemsize


def _tpu_generation_info():
    """Returns (vmem_capacity_bytes, tensorcores_per_chip). Robust fallbacks."""
    kind = ""
    try:
        kind = jax.devices()[0].device_kind.lower()
    except Exception:
        pass
    vmem_cap = None
    try:
        vmem_cap = int(pltpu.get_tpu_info().vmem_capacity_bytes)
    except Exception:
        vmem_cap = None
    if vmem_cap is None:
        vmem_cap = (64 << 20) if "7" in kind else (128 << 20)
    # Chips with 2 TensorCores sharing one grid via dimension_semantics.
    two_tc = any(t in kind for t in ("7", "v4", "v5p"))
    return vmem_cap, (2 if two_tc else 1)


def _choose_block_batch(batch, per_row_vmem_bytes, *, stream_budget_bytes,
                        tb_cap, min_steps):
    """Largest batch tile whose double-buffered streams fit the budget."""
    tb = stream_budget_bytes // max(per_row_vmem_bytes, 1)
    tb = max(8, min(int(tb), tb_cap))
    tb = (tb // 8) * 8                      # sublane alignment
    if min_steps > 1 and batch > 8 * min_steps:
        # Ensure >= min_steps grid steps so ("parallel",) shards across TCs.
        tb = min(tb, _round_up(pl.cdiv(batch, min_steps), 8))
    if batch <= tb:
        return batch                         # full-dim block is always legal
    return tb


def collapse_and_pad_params(flat_params, num_layers):
    """Collapse the Linear stack to one affine map; apply the output lane policy.

    Call ONCE per parameter set (hoisted out of the per-call path).
    flat_params = [W0a, W0b, b0, W1, b1, ..., W_{L-1}, b_{L-1}]  (weights (in,out))
    Returns (Wa_eff, Wb_eff, b_eff, out_features).

    VALIDITY GUARD: this algebraic collapse is correct only because
    DoubleInputEuclideanMLP has no nonlinearity / dropout / normalization
    between its nn.Linear layers.  If the module ever gains one, this helper
    must be replaced by chained per-layer kernels.
    """
    wa, wb, b = flat_params[0], flat_params[1], flat_params[2]
    idx = 3
    for _ in range(num_layers - 1):
        w, bb = flat_params[idx], flat_params[idx + 1]
        idx += 2
        wa = wa @ w
        wb = wb @ w
        b = b @ w + bb
    out_features = int(b.shape[-1])
    # Lane policy: pad to a 128-multiple only when already >= 128 wide
    # (lane-dense unmasked stores).  Below 128 the masked store writes far
    # fewer HBM bytes and avoids a second slicing pass.
    if out_features > _LANE and out_features % _LANE != 0:
        n_w = _round_up(out_features, _LANE)
        pad = ((0, 0), (0, n_w - out_features))
        wa, wb, b = jnp.pad(wa, pad), jnp.pad(wb, pad), jnp.pad(b, pad)
    return wa, wb, b, out_features


# --------------------------------------------------------------------------
# Public entry point
# --------------------------------------------------------------------------
@functools.partial(jax.jit, static_argnames=("out_features", "block_batch"))
def double_input_euclidean_mlp(x1, x2, wa, wb, b, *, out_features,
                               block_batch=None):
    """Fused forward of DoubleInputEuclideanMLP.

    wa/wb/b are the collapsed (and possibly lane-padded) affine params from
    collapse_and_pad_params.  block_batch overrides the batch tile (testing).
    """
    batch, f1 = x1.shape
    _, f2 = x2.shape
    n_w = wa.shape[-1]                      # possibly lane-padded output width
    out_dtype = x1.dtype
    in_bytes = jnp.dtype(x1.dtype).itemsize
    out_bytes = jnp.dtype(out_dtype).itemsize

    vmem_cap, n_tc = _tpu_generation_info()
    big_vmem = vmem_cap >= (96 << 20)       # v5e/v6e (128 MiB) vs v7x (64 MiB)
    stream_budget = (24 << 20) if big_vmem else (16 << 20)
    tb_cap = 4096 if big_vmem else 2048

    # Double-buffered stream bytes per batch row, with (8,128) lane padding.
    per_row = 2 * ((_round_up(f1, _LANE) + _round_up(f2, _LANE)) * in_bytes
                   + _round_up(n_w, _LANE) * out_bytes)

    if block_batch is None:
        tb = _choose_block_batch(batch, per_row,
                                 stream_budget_bytes=stream_budget,
                                 tb_cap=tb_cap, min_steps=n_tc)
    else:
        tb = min(int(block_batch), batch)
    grid = (pl.cdiv(batch, tb),)

    # Weight residency (constant index maps). Double-buffered by default; drop
    # to a single buffer when the collapsed weights get large (v7x guard).
    w_bytes = (_vmem_block_bytes(f1, n_w, wa.dtype)
               + _vmem_block_bytes(f2, n_w, wb.dtype)
               + _vmem_block_bytes(1, n_w, b.dtype))
    single_buffer_weights = w_bytes > (4 << 20)
    w_copies = 1 if single_buffer_weights else 2

    act_bytes = 2 * (_vmem_block_bytes(tb, f1, x1.dtype)
                     + _vmem_block_bytes(tb, f2, x2.dtype)
                     + _vmem_block_bytes(tb, n_w, out_dtype))
    vmem_need = act_bytes + w_copies * w_bytes
    vmem_hard_cap = min(48 << 20, (vmem_cap * 6) // 10)   # ~38 MiB on v7x
    vmem_limit = int(min(max(vmem_need + (2 << 20), 4 << 20), vmem_hard_cap))

    def _wspec(shape):
        if single_buffer_weights:
            return pl.BlockSpec(shape, lambda i: (0, 0),
                                pipeline_mode=pl.Buffered(1))
        return pl.BlockSpec(shape, lambda i: (0, 0))

    out = pl.pallas_call(
        _fused_mlp_kernel,
        out_shape=jax.ShapeDtypeStruct((batch, n_w), out_dtype),
        grid=grid,
        in_specs=[
            pl.BlockSpec((tb, f1), lambda i: (i, 0)),       # x1: streamed
            pl.BlockSpec((tb, f2), lambda i: (i, 0)),       # x2: streamed
            _wspec((f1, n_w)),                              # Wa: VMEM resident
            _wspec((f2, n_w)),                              # Wb: VMEM resident
            _wspec((1, n_w)),                               # b : VMEM resident
        ],
        out_specs=pl.BlockSpec((tb, n_w), lambda i: (i, 0)),
        compiler_params=pltpu.CompilerParams(
            dimension_semantics=("parallel",),   # shards batch across TCs
            vmem_limit_bytes=vmem_limit,
        ),
    )(x1, x2, wa, wb, b)

    if n_w != out_features:
        out = out[:, :out_features]
    return out


# --------------------------------------------------------------------------
# Parameter init / pure-JAX reference (mirrors the PyTorch module)
# --------------------------------------------------------------------------
def init_params(key, in_features, hidden_features, out_features):
    """Deterministic init mirroring the stacked nn.Linear layers.

    dims = [sum(in_features)] + hidden_features + [out_features].
    Weights stored as (in, out) (transposed vs torch), biases as (1, out).
    The first weight is pre-split between x1 and x2.
    """
    f1, f2 = in_features
    dims = [f1 + f2] + list(hidden_features) + [out_features]
    flat = []
    for i in range(len(dims) - 1):
        din, dout = dims[i], dims[i + 1]
        key, kw, kb = jax.random.split(key, 3)
        bound = 1.0 / jnp.sqrt(din)
        w = jax.random.uniform(kw, (din, dout), jnp.float32, -bound, bound)
        bvec = jax.random.uniform(kb, (1, dout), jnp.float32, -bound, bound)
        if i == 0:
            flat.extend([w[:f1, :], w[f1:, :], bvec])
        else:
            flat.extend([w, bvec])
    return flat, len(dims) - 1


def reference_forward(x1, x2, flat_params, num_layers):
    """Pure-JAX reference: chained Linear layers (PyTorch semantics)."""
    w0a, w0b, b0 = flat_params[0], flat_params[1], flat_params[2]
    h = x1 @ w0a + x2 @ w0b + b0
    idx = 3
    for _ in range(num_layers - 1):
        w, b = flat_params[idx], flat_params[idx + 1]
        idx += 2
        h = h @ w + b
    return h


# --------------------------------------------------------------------------
# Self-test
# --------------------------------------------------------------------------
if __name__ == "__main__":
    key = jax.random.PRNGKey(0)
    k1, k2, k3, k4, kp, kp2 = jax.random.split(key, 6)

    # Case 1: small shapes consistent with the module (masked-store path).
    batch = 8
    in_features = (16, 16)
    hidden_features = [64, 32]
    out_features = 16

    x1 = jax.random.normal(k1, (batch, in_features[0]), jnp.float32)
    x2 = jax.random.normal(k2, (batch, in_features[1]), jnp.float32)
    flat_params, num_layers = init_params(kp, in_features, hidden_features,
                                          out_features)
    wa, wb, b, out_f = collapse_and_pad_params(flat_params, num_layers)

    out = double_input_euclidean_mlp(x1, x2, wa, wb, b, out_features=out_f)
    out = jax.block_until_ready(out)
    ref = reference_forward(x1, x2, flat_params, num_layers)
    assert out.shape == (batch, out_features)
    assert jnp.allclose(out, ref, atol=1e-4, rtol=1e-4), (
        float(jnp.max(jnp.abs(out - ref))))

    # Case 2: batch not a multiple of the tile + forced small tile -> exercises
    # the masked partial last block (no padded-row leakage into the output).
    batch2 = 37
    x1b = jax.random.normal(k3, (batch2, in_features[0]), jnp.float32)
    x2b = jax.random.normal(k4, (batch2, in_features[1]), jnp.float32)
    out2 = double_input_euclidean_mlp(x1b, x2b, wa, wb, b,
                                      out_features=out_f, block_batch=16)
    out2 = jax.block_until_ready(out2)
    ref2 = reference_forward(x1b, x2b, flat_params, num_layers)
    assert out2.shape == (batch2, out_features)
    assert jnp.allclose(out2, ref2, atol=1e-4, rtol=1e-4), (
        float(jnp.max(jnp.abs(out2 - ref2))))

    # Case 3: out_features > 128 and not a multiple of 128 -> exercises the
    # lane-dense padded-store path plus the post-kernel slice.
    flat_params3, num_layers3 = init_params(kp2, in_features, [32], 160)
    wa3, wb3, b3, out_f3 = collapse_and_pad_params(flat_params3, num_layers3)
    out3 = double_input_euclidean_mlp(x1, x2, wa3, wb3, b3,
                                      out_features=out_f3)
    out3 = jax.block_until_ready(out3)
    ref3 = reference_forward(x1, x2, flat_params3, num_layers3)
    assert out3.shape == (batch, 160)
    assert jnp.allclose(out3, ref3, atol=1e-4, rtol=1e-4), (
        float(jnp.max(jnp.abs(out3 - ref3))))

    print("KERNEL_OK")
</pallas_src>

<mosaic_0001>
module attributes {stable_mosaic.version = 11 : i64} {
  func.func @_fused_mlp_kernel(%arg0: i32, %arg1: memref<8x16xf32, #tpu.memory_space<vmem>>, %arg2: memref<8x16xf32, #tpu.memory_space<vmem>>, %arg3: memref<16x16xf32, #tpu.memory_space<vmem>>, %arg4: memref<16x16xf32, #tpu.memory_space<vmem>>, %arg5: memref<1x16xf32, #tpu.memory_space<vmem>>, %arg6: memref<8x16xf32, #tpu.memory_space<vmem>>) attributes {dimension_semantics = [#tpu.dimension_semantics<parallel>], iteration_bounds = array<i64: 1>, scalar_prefetch = 0 : i64, scratch_operands = 0 : i64, tpu.core_type = #tpu.core_type<tc>, window_params = [{transform_indices = @transform_0, window_bounds = array<i64: 8, 16>}, {transform_indices = @transform_1, window_bounds = array<i64: 8, 16>}, {pipeline_mode = #tpu.pipeline_mode<synchronous>, transform_indices = @transform_2, window_bounds = array<i64: 16, 16>}, {pipeline_mode = #tpu.pipeline_mode<synchronous>, transform_indices = @transform_3, window_bounds = array<i64: 16, 16>}, {pipeline_mode = #tpu.pipeline_mode<synchronous>, transform_indices = @transform_4, window_bounds = array<i64: 1, 16>}, {transform_indices = @transform_5, window_bounds = array<i64: 8, 16>}]} {
    %c0 = arith.constant 0 : index
    %c0_0 = arith.constant 0 : index
    %0 = vector.load %arg1[%c0, %c0_0] : memref<8x16xf32, #tpu.memory_space<vmem>>, vector<8x16xf32>
    %c0_1 = arith.constant 0 : index
    %c0_2 = arith.constant 0 : index
    %1 = vector.load %arg3[%c0_1, %c0_2] : memref<16x16xf32, #tpu.memory_space<vmem>>, vector<16x16xf32>
    %cst = arith.constant dense<0.000000e+00> : vector<8x16xf32>
    %2 = tpu.matmul %0, %1, %cst {dimension_numbers = #tpu.dot_dimension_numbers<[1], [0], [0], [1], [0, 0, 1, 1], [], []>} : vector<8x16xf32>, vector<16x16xf32>, vector<8x16xf32> -> vector<8x16xf32>
    %c0_3 = arith.constant 0 : index
    %c0_4 = arith.constant 0 : index
    %3 = vector.load %arg2[%c0_3, %c0_4] : memref<8x16xf32, #tpu.memory_space<vmem>>, vector<8x16xf32>
    %c0_5 = arith.constant 0 : index
    %c0_6 = arith.constant 0 : index
    %4 = vector.load %arg4[%c0_5, %c0_6] : memref<16x16xf32, #tpu.memory_space<vmem>>, vector<16x16xf32>
    %cst_7 = arith.constant dense<0.000000e+00> : vector<8x16xf32>
    %5 = tpu.matmul %3, %4, %cst_7 {dimension_numbers = #tpu.dot_dimension_numbers<[1], [0], [0], [1], [0, 0, 1, 1], [], []>} : vector<8x16xf32>, vector<16x16xf32>, vector<8x16xf32> -> vector<8x16xf32>
    %6 = arith.addf %2, %5 : vector<8x16xf32>
    %c0_8 = arith.constant 0 : index
    %c0_9 = arith.constant 0 : index
    %7 = vector.load %arg5[%c0_8, %c0_9] : memref<1x16xf32, #tpu.memory_space<vmem>>, vector<1x16xf32>
    %8 = vector.broadcast %7 : vector<1x16xf32> to vector<8x16xf32>
    %9 = arith.addf %6, %8 : vector<8x16xf32>
    %c0_10 = arith.constant 0 : index
    %c0_11 = arith.constant 0 : index
    %10 = vector.load %arg6[%c0_10, %c0_11] : memref<8x16xf32, #tpu.memory_space<vmem>>, vector<8x16xf32>
    tpu.vector_store %arg6[%c0_10, %c0_11], %9 {strides = array<i32>} : memref<8x16xf32, #tpu.memory_space<vmem>>, vector<8x16xf32>,
    return
  }
  func.func @transform_0(%arg0: i32) -> (i32, i32) {
    %c0_i32 = arith.constant 0 : i32
    %c0_i32_0 = arith.constant 0 : i32
    return %arg0, %c0_i32 : i32, i32
  }
  func.func @transform_1(%arg0: i32) -> (i32, i32) {
    %c0_i32 = arith.constant 0 : i32
    %c0_i32_0 = arith.constant 0 : i32
    return %arg0, %c0_i32 : i32, i32
  }
  func.func @transform_2(%arg0: i32) -> (i32, i32) {
    %c0_i32 = arith.constant 0 : i32
    %c0_i32_0 = arith.constant 0 : i32
    %c0_i32_1 = arith.constant 0 : i32
    return %c0_i32, %c0_i32_0 : i32, i32
  }
  func.func @transform_3(%arg0: i32) -> (i32, i32) {
    %c0_i32 = arith.constant 0 : i32
    %c0_i32_0 = arith.constant 0 : i32
    %c0_i32_1 = arith.constant 0 : i32
    return %c0_i32, %c0_i32_0 : i32, i32
  }
  func.func @transform_4(%arg0: i32) -> (i32, i32) {
    %c0_i32 = arith.constant 0 : i32
    %c0_i32_0 = arith.constant 0 : i32
    %c0_i32_1 = arith.constant 0 : i32
    return %c0_i32, %c0_i32_0 : i32, i32
  }
  func.func @transform_5(%arg0: i32) -> (i32, i32) {
    %c0_i32 = arith.constant 0 : i32
    %c0_i32_0 = arith.constant 0 : i32
    return %arg0, %c0_i32 : i32, i32
  }
}

</mosaic_0001>

<bundles_post_ra>
// kernel: double_input_euclidean_mlp.1
= control target key start
LH: loop header
LB: loop body
LE: loop exit
PB: predicated region body
PF: predicated region fallthrough
CT: control target
= control target key end

     0   :  { %10 = vsyncpa [#allocation3], 0  ;;  %s451_s0 = inlined_call_operand.hbm [shape: f32[8,16], index: 0, kind: input, shape index: {}]   ;;  %s452_s1 = inlined_call_operand.hbm [shape: f32[8,16], index: 1, kind: input, shape index: {}]   ;;  %s453_s2 = inlined_call_operand.hbm [shape: f32[16,16], index: 2, kind: input, shape index: {}]   ;;  %s454_s3 = inlined_call_operand.hbm [shape: f32[16,16], index: 3, kind: input, shape index: {}]   ;;  %s455_s4 = inlined_call_operand.vmem [shape: f32[1,16], index: 4, kind: input, shape index: {}]   ;;  %s456_s5 = inlined_call_operand.hbm [shape: f32[8,16], index: 5, kind: output, shape index: {}]  }
   0x1   :  { %11 = vsyncpa [#allocation6], 0 }
   0x2   :  { %12 = vsyncpa [#allocation9], 0 }
   0x3   :  { %13 = vsyncpa [#allocation4], 0  ;;  %s391_s18 = smov [#allocation5]   ;;  %s392_s20 = smov [#allocation2]  }
   0x4   :  { %s30_s19 = sshll.u32 %s391_s18, 4  ;;  %s20_s21 = sshll.u32 %s392_s20, 4  ;;  %s31_s19 = int_to_ptr.vmem [resolvable:$true] %s30_s19  ;;  %s21_s21 = int_to_ptr.vmem [resolvable:$true] %s20_s21 }
   0x5   :  { %s291_s22 = scalar_lea.vmem %s31_s19, 128  ;;  %p296_p1 = scmp.lt.s32.totalorder %s31_s19, %s31_s19 }
   0x6   :  { %p292_p0 = scmp.ne.s32.totalorder %s31_s19, %s291_s22  ;;  %p297_p2 = scmp.lt.s32.totalorder %s291_s22, %s291_s22 }
   0x8   :  { %p298_p3 = por %p297_p2, %p296_p1 }
   0xa   :  { %p299_p4 = pnand %p298_p3, %p292_p0 }
   0xc   :  { %302 = shalt.err (!%p299_p4)
}
   0xd   :  { %33 = dma.hbm_to_vmem [thread:$0]  %s452_s1, 128, %s31_s19, [#allocation6]  }
   0xe   :  { %s311_s25 = scalar_lea.vmem %s21_s21, 128  ;;  %p316_p6 = scmp.lt.s32.totalorder %s21_s21, %s21_s21 }
   0xf   :  { %p312_p5 = scmp.ne.s32.totalorder %s21_s21, %s311_s25  ;;  %p317_p7 = scmp.lt.s32.totalorder %s311_s25, %s311_s25 }
  0x11   :  { %p318_p8 = por %p317_p7, %p316_p6 }
  0x13   :  { %p319_p9 = pnand %p318_p8, %p312_p5 }
  0x15   :  { %322 = shalt.err (!%p319_p9)
}
  0x16   :  { %23 = dma.hbm_to_vmem [thread:$0]  %s451_s0, 128, %s21_s21, [#allocation3]  }
  0x17   :  { %s393_s28 = smov [#allocation7]  }
  0x18   :  { %s39_s29 = sshll.u32 %s393_s28, 4  ;;  %s40_s29 = int_to_ptr.vmem [resolvable:$true] %s39_s29 }
  0x19   :  { %s331_s30 = scalar_lea.vmem %s40_s29, 256  ;;  %p336_p11 = scmp.lt.s32.totalorder %s40_s29, %s40_s29 }
  0x1a   :  { %p332_p10 = scmp.ne.s32.totalorder %s40_s29, %s331_s30  ;;  %p337_p12 = scmp.lt.s32.totalorder %s331_s30, %s331_s30 }
  0x1c   :  { %p338_p13 = por %p337_p12, %p336_p11 }
  0x1e   :  { %p339_p0 = pnand %p338_p13, %p332_p10 }
  0x20   :  { %342 = shalt.err (!%p339_p0)
}
  0x21   :  { %s394_s1 = smov 128   ;;  %s395_s6 = smov 8  }
  0x22   :  { %45 = dma.hbm_to_vmem [thread:$0]  %s453_s2, 256, %s40_s29, [#allocation6], %s394_s1, %s394_s1, %s395_s6  }
  0x23   :  { %s396_s9 = smov [#allocation8]  }
  0x24   :  { %s51_s10 = sshll.u32 %s396_s9, 4  ;;  %s52_s10 = int_to_ptr.vmem [resolvable:$true] %s51_s10 }
  0x25   :  { %s351_s0 = scalar_lea.vmem %s52_s10, 256  ;;  %p356_p2 = scmp.lt.s32.totalorder %s52_s10, %s52_s10 }
  0x26   :  { %p352_p1 = scmp.ne.s32.totalorder %s52_s10, %s351_s0  ;;  %p357_p3 = scmp.lt.s32.totalorder %s351_s0, %s351_s0 }
  0x28   :  { %p358_p4 = por %p357_p3, %p356_p2 }
  0x2a   :  { %p359_p5 = pnand %p358_p4, %p352_p1 }
  0x2c   :  { %362 = shalt.err (!%p359_p5)
}
  0x2d   :  { %57 = dma.hbm_to_vmem [thread:$0]  %s454_s3, 256, %s52_s10, [#allocation9], %s394_s1, %s394_s1, %s395_s6  }
  0x2e   :  { %383 = dma.done.wait [#allocation3], 128  }
  0x2f   :  { %384 = vsyncadd [#allocation3], 4294967168 }
  0x30   :  { %385 = dma.done.wait [#allocation6], 384  }
  0x31   :  { %386 = vsyncadd [#allocation6], 4294966912 }
  0x32   :  { %387 = dma.done.wait [#allocation9], 256  }
  0x33   :  { %388 = vsyncadd [#allocation9], 4294967040  ;;  %v397_v0 = vmov 0.0   ;;  %vm398_vm0 = vmmov 0   ;;  %v77_v1 = vld [vmem:[#allocation8 + $0x8] sm:$0xff]  ;;  %v74_v2 = vld [vmem:[#allocation7 + $0x8] sm:$0xff] }
  0x34   :  { %260 = vmatprep.subr.mxu0 %v397_v0  ;;  %267 = vmatprep.subr.mxu1 %v397_v0  ;;  %v76_v3 = vld [vmem:[#allocation8] sm:$0xff]  ;;  %v73_v4 = vld [vmem:[#allocation7] sm:$0xff]  ;;  %v75_v5 = vld [vmem:[#allocation5] sm:$0xff]  ;;  %vm78_vm1 = vcmask 130048   ;;  %s399_s13 = smov [#allocation10]  }
  0x35   :  { %264 = vmatprep.mubr.msk.f32.mxu0 %vm398_vm0, %v397_v0  ;;  %271 = vmatprep.mubr.msk.f32.mxu1 %vm398_vm0, %v397_v0  ;;  %v72_v6 = vld [vmem:[#allocation2] sm:$0xff]  ;;  %s240_s14 = sshll.u32 %s399_s13, 4  ;;  %s241_s14 = int_to_ptr.vmem [resolvable:$true] %s240_s14 }
  0x36   :  { %261 = vmatpush3.msra.mxu0 %v77_v1  ;;  %268 = vmatpush3.msra.mxu1 %v74_v2  ;;  %v253_v9 = vld [vmem:[%s455_s4] ss:$0 sm:$0xff]  ;;  %s363_s15 = scalar_lea.vmem %s241_s14, 128  ;;  %p368_p7 = scmp.lt.s32.totalorder %s241_s14, %s241_s14 }
  0x37   :  { %262 = vmatprep.subr.mxu0 %v397_v0  ;;  %269 = vmatprep.subr.mxu1 %v397_v0  ;;  %p364_p6 = scmp.ne.s32.totalorder %s241_s14, %s363_s15  ;;  %p369_p8 = scmp.lt.s32.totalorder %s363_s15, %s363_s15 }
  0x38   :  { %263 = vmatpush3.msra.mxu0 %v76_v3  ;;  %270 = vmatpush3.msra.mxu1 %v73_v4 }
  0x39   :  { %265 = vmatmul.mubr.msk.f32.vlgmr.msra.gmra.mxu0 %vm78_vm1, %v75_v5  ;;  %272 = vmatmul.mubr.msk.f32.vlgmr.msra.gmra.mxu1 %vm78_vm1, %v72_v6  ;;  %p370_p9 = por %p369_p8, %p368_p7 }
  0x3b   :  { %p371_p10 = pnand %p370_p9, %p364_p6 }
  0xf9   :  { %v148_v7 = vpop.f32.mrf.mxu0  ;;  %v221_v8 = vpop.f32.mrf.mxu1 }
  0xfa   :  { %v222_v10 = vadd.f32 %v221_v8, %v148_v7 }
  0xfb   :  { %v266_v11 = vpop.f32.mrf.mxu0  ;;  %v273_v12 = vpop.f32.mrf.mxu1 }
  0xfc   :  { %v232_v13 = vadd.f32 %v253_v9, %v222_v10 }
  0xfe   :  { %233 = vst.msk [vmem:[#allocation10] sm:$0xff] %vm78_vm1, %v232_v13 }
  0xff   :  { %374 = shalt.err (!%p371_p10)
}
 0x100   :  { %243 = dma.vmem_to_hbm [thread:$0]  %s241_s14, 128, %s456_s5, [#allocation4]  }
 0x101   :  { %389 = dma.done.wait [#allocation4], 128  }
 0x102   :  { %390 = vsyncadd [#allocation4], 4294967168 }
 0x103   :  { %247 = vsyncpa [#allocation3], 1 }
 0x104   :  { %248 = vsyncpa [#allocation6], 1 }
 0x105   :  { %249 = vsyncpa [#allocation9], 1 }
 0x106   :  { %250 = vsyncpa [#allocation4], 1 }

</bundles_post_ra>
